<compile_context>
chip_gen: v6e
topology: v6e:2x2x1
jax: 0.10.0
libtpu: 0.0.40
codegen_flags: <defaults>
</compile_context>

<pallas_src>
import jax
import jax.numpy as jnp
from jax.experimental import pallas as pl
from jax.experimental.pallas import tpu as pltpu  # noqa: F401  (kept for API parity)

N = 3  # problem size from the module: x is (3, 3)


def tanh_matmul_kernel(x_ref, o_ref):
    # tanh on the 9 occupied elements (single EUP-bound vreg op).
    z = jnp.tanh(x_ref[...])  # (3, 3) f32

    # out[i, j] = sum_k z[i, k] * z[k, j]
    # Unrolled K=3 broadcast-MAC on the VPU: column_k (3,1) * row_k (1,3).
    acc = z[:, 0:1] * z[0:1, :]
    acc = acc + z[:, 1:2] * z[1:2, :]
    acc = acc + z[:, 2:3] * z[2:3, :]

    o_ref[...] = acc.astype(o_ref.dtype)


def tanh_self_matmul(x):
    """Returns tanh(x) @ tanh(x) as float32 for the module's (3, 3) input."""
    n, m = x.shape
    assert n == m == N, "module defines a 3x3 self-matmul"
    # TODO(synk): torch reference computes in float64; TPU Pallas computes f32
    # (output dtype matches torch.float as requested by init_tensor).
    x32 = x.astype(jnp.float32)

    return pl.pallas_call(
        tanh_matmul_kernel,
        out_shape=jax.ShapeDtypeStruct((N, N), jnp.float32),
        # block_shape == full array dims -> no (8,128) divisibility needed,
        # no wrapper pad/slice, single block, no grid, no scratch.
        in_specs=[pl.BlockSpec((N, N), lambda: (0, 0))],
        out_specs=pl.BlockSpec((N, N), lambda: (0, 0)),
    )(x32)


if __name__ == "__main__":
    key = jax.random.PRNGKey(0)
    # Module's global example: x = torch.randn((3, 3), dtype=torch.float64)
    x = jax.random.normal(key, (N, N), dtype=jnp.float32)

    out = tanh_self_matmul(x)
    jax.block_until_ready(out)

    # Sanity check against plain-JAX reference.
    ref = jnp.tanh(x) @ jnp.tanh(x)
    assert out.shape == (N, N) and out.dtype == jnp.float32
    assert jnp.allclose(out, ref, atol=1e-5, rtol=1e-5)

    print("KERNEL_OK")
</pallas_src>

<mosaic_0001>
module attributes {stable_mosaic.version = 11 : i64} {
  func.func @tanh_matmul_kernel(%arg0: memref<3x3xf32, #tpu.memory_space<vmem>>, %arg1: memref<3x3xf32, #tpu.memory_space<vmem>>) attributes {dimension_semantics = [], scalar_prefetch = 0 : i64, scratch_operands = 0 : i64, tpu.core_type = #tpu.core_type<tc>} {
    %c0 = arith.constant 0 : index
    %c0_0 = arith.constant 0 : index
    %0 = vector.load %arg0[%c0, %c0_0] : memref<3x3xf32, #tpu.memory_space<vmem>>, vector<3x3xf32>
    %1 = math.tanh %0 : vector<3x3xf32>
    %2 = vector.extract_strided_slice %1 {offsets = [0, 0], sizes = [3, 1], strides = [1, 1]} : vector<3x3xf32> to vector<3x1xf32>
    %3 = vector.extract_strided_slice %1 {offsets = [0, 0], sizes = [1, 3], strides = [1, 1]} : vector<3x3xf32> to vector<1x3xf32>
    %4 = vector.broadcast %2 : vector<3x1xf32> to vector<3x3xf32>
    %5 = vector.broadcast %3 : vector<1x3xf32> to vector<3x3xf32>
    %6 = arith.mulf %4, %5 : vector<3x3xf32>
    %7 = vector.extract_strided_slice %1 {offsets = [0, 1], sizes = [3, 1], strides = [1, 1]} : vector<3x3xf32> to vector<3x1xf32>
    %8 = vector.extract_strided_slice %1 {offsets = [1, 0], sizes = [1, 3], strides = [1, 1]} : vector<3x3xf32> to vector<1x3xf32>
    %9 = vector.broadcast %7 : vector<3x1xf32> to vector<3x3xf32>
    %10 = vector.broadcast %8 : vector<1x3xf32> to vector<3x3xf32>
    %11 = arith.mulf %9, %10 : vector<3x3xf32>
    %12 = arith.addf %6, %11 : vector<3x3xf32>
    %13 = vector.extract_strided_slice %1 {offsets = [0, 2], sizes = [3, 1], strides = [1, 1]} : vector<3x3xf32> to vector<3x1xf32>
    %14 = vector.extract_strided_slice %1 {offsets = [2, 0], sizes = [1, 3], strides = [1, 1]} : vector<3x3xf32> to vector<1x3xf32>
    %15 = vector.broadcast %13 : vector<3x1xf32> to vector<3x3xf32>
    %16 = vector.broadcast %14 : vector<1x3xf32> to vector<3x3xf32>
    %17 = arith.mulf %15, %16 : vector<3x3xf32>
    %18 = arith.addf %12, %17 : vector<3x3xf32>
    %c0_1 = arith.constant 0 : index
    %c0_2 = arith.constant 0 : index
    %19 = vector.load %arg1[%c0_1, %c0_2] : memref<3x3xf32, #tpu.memory_space<vmem>>, vector<3x3xf32>
    tpu.vector_store %arg1[%c0_1, %c0_2], %18 {strides = array<i32>} : memref<3x3xf32, #tpu.memory_space<vmem>>, vector<3x3xf32>,
    return
  }
}

</mosaic_0001>

<bundles_post_ra>
// kernel: tpu_custom_call.1
= control target key start
LH: loop header
LB: loop body
LE: loop exit
PB: predicated region body
PF: predicated region fallthrough
CT: control target
= control target key end

     0   :  { %6 = vsyncpa [#allocation3], 0  ;;  %s146_s0 = inlined_call_operand.hbm [shape: f32[3,3], index: 0, kind: input, shape index: {}]   ;;  %s147_s1 = inlined_call_operand.hbm [shape: f32[3,3], index: 1, kind: output, shape index: {}]  }
   0x1   :  { %7 = vsyncpa [#allocation4], 0  ;;  %s125_s6 = smov [#allocation2]  }
   0x2   :  { %s14_s7 = sshll.u32 %s125_s6, 4  ;;  %s15_s7 = int_to_ptr.vmem [resolvable:$true] %s14_s7 }
   0x3   :  { %s89_s8 = scalar_lea.vmem %s15_s7, 64  ;;  %p94_p1 = scmp.lt.s32.totalorder %s15_s7, %s15_s7 }
   0x4   :  { %p90_p0 = scmp.ne.s32.totalorder %s15_s7, %s89_s8  ;;  %p95_p2 = scmp.lt.s32.totalorder %s89_s8, %s89_s8 }
   0x6   :  { %p96_p3 = por %p95_p2, %p94_p1 }
   0x8   :  { %p97_p4 = pnand %p96_p3, %p90_p0 }
   0xa   :  { %100 = shalt.err (!%p97_p4)
}
   0xb   :  { %17 = dma.hbm_to_vmem [thread:$0]  %s146_s0, 64, %s15_s7, [#allocation3]  }
   0xc   :  { %121 = dma.done.wait [#allocation3], 64  }
   0xd   :  { %122 = vsyncadd [#allocation3], 4294967232  ;;  %v126_v0 = vmov 0   ;;  %v127_v1 = vmov 2   ;;  %v21_v2 = vld [vmem:[#allocation2] sm:$0x7]  ;;  %v28_v5 = vlaneseq }
   0xe   :  { %75 = vset.pattern.permute.xlu0 %v126_v0  ;;  %77 = vset.pattern.permute.xlu1 %v127_v1  ;;  %79 = vtanh.f32 %v21_v2  ;;  %v128_v4 = vmov 1   ;;  %s129_s0 = smov [#allocation5]   ;;  %vm53_vm0 = vcmask 18432  }
   0xf   :  { %v29_v6 = vshrl.u32 %v28_v5, 7  ;;  %s61_s11 = sshll.u32 %s129_s0, 4  ;;  %s62_s11 = int_to_ptr.vmem [resolvable:$true] %s61_s11 }
  0x10   :  { %s101_s12 = scalar_lea.vmem %s62_s11, 64  ;;  %p106_p6 = scmp.lt.s32.totalorder %s62_s11, %s62_s11 }
  0x11   :  { %v30_v7 = vsub.s32 0, %v29_v6  ;;  %v39_v8 = vsub.s32 1, %v29_v6  ;;  %v49_v9 = vsub.s32 2, %v29_v6  ;;  %p102_p5 = scmp.ne.s32.totalorder %s62_s11, %s101_s12  ;;  %p107_p7 = scmp.lt.s32.totalorder %s101_s12, %s101_s12 }
  0x13   :  { %p108_p8 = por %p107_p7, %p106_p6 }
  0x15   :  { %p109_p9 = pnand %p108_p8, %p102_p5 }
  0x1b   :  { %v80_v3 = vpop.eup %79 }
  0x1c   :  { %25 = vperm.xlu0 %75, %v80_v3   ;;  %44 = vperm.xlu1 %77, %v80_v3   ;;  %v31_v11 = vrot.slane %v80_v3, %v30_v7  ;;  %v40_v12 = vrot.slane %v80_v3, %v39_v8  ;;  %v50_v13 = vrot.slane %v80_v3, %v49_v9 }
  0x20   :  { %76 = vset.pattern.permute.xlu0 %v128_v4 }
  0x21   :  { %34 = vperm.xlu0 %76, %v80_v3  }
  0x25   :  { %78 = vset.pattern.permute.xlu0 %v127_v1 }
  0x97   :  { %v26_v10 = vpop.permute.xlu0 %25  ;;  %v45_v14 = vpop.permute.xlu1 %44 }
  0x98   :  { %v32_v16 = vmul.f32 %v31_v11, %v26_v10  ;;  %v51_v18 = vmul.f32 %v50_v13, %v45_v14 }
  0x9c   :  { %v35_v15 = vpop.permute.xlu0 %34 }
  0x9d   :  { %v41_v17 = vmul.f32 %v40_v12, %v35_v15 }
  0x9f   :  { %v42_v19 = vadd.f32 %v41_v17, %v32_v16 }
  0xa1   :  { %v52_v20 = vadd.f32 %v51_v18, %v42_v19 }
  0xa3   :  { %54 = vst.msk [vmem:[#allocation5] sm:$0x7] %vm53_vm0, %v52_v20 }
  0xa4   :  { %112 = shalt.err (!%p109_p9)
}
  0xa5   :  { %64 = dma.vmem_to_hbm [thread:$0]  %s62_s11, 64, %s147_s1, [#allocation4]  }
  0xa6   :  { %123 = dma.done.wait [#allocation4], 64  }
  0xa7   :  { %124 = vsyncadd [#allocation4], 4294967232 }
  0xa8   :  { %68 = vsyncpa [#allocation3], 1 }
  0xa9   :  { %69 = vsyncpa [#allocation4], 1 }

</bundles_post_ra>
